<compile_context>
chip_gen: v7x
topology: tpu7x:2x2x1
jax: 0.10.0
libtpu: 0.0.40
codegen_flags: <defaults>
</compile_context>

<pallas_src>
import functools

import numpy as np
import jax
import jax.numpy as jnp
from jax import lax
from jax.experimental import pallas as pl
from jax.experimental.pallas import tpu as pltpu

_VMEM_LIMIT = 32 * 1024 * 1024  # raise scoped VMEM (v5e default is only 16 MiB)


# --------------------------------------------------------------------------------------
# Kernel 1: fused projection head (Linear -> ReLU -> Linear) + L2 normalize +
#           self-similarity gram matrix. One grid step per view (x1 / x2).
# TODO(synk): ProjectionHead internals are not defined in the reference snippet;
#             modeled as Linear -> ReLU -> Linear (BatchNorm treated as eval-mode identity).
# --------------------------------------------------------------------------------------
def proj_sim_kernel(x_ref, w1_ref, b1_ref, w2_ref, b2_ref, sim_ref):
    # bf16 MXU matmuls, f32 accumulation
    x = x_ref[...].astype(jnp.bfloat16)
    h = jnp.dot(x, w1_ref[...].astype(jnp.bfloat16),
                preferred_element_type=jnp.float32) + b1_ref[...]
    h = jnp.maximum(h, 0.0)
    o = jnp.dot(h.astype(jnp.bfloat16), w2_ref[...].astype(jnp.bfloat16),
                preferred_element_type=jnp.float32) + b2_ref[...]
    # F.normalize(dim=1, eps=1e-12) via EUP rsqrt
    sumsq = jnp.sum(o * o, axis=1, keepdims=True)
    feat = o * lax.rsqrt(jnp.maximum(sumsq, 1e-24))
    fb = feat.astype(jnp.bfloat16)
    sim_ref[...] = lax.dot_general(
        fb, fb,
        dimension_numbers=(((1,), (1,)), ((), ())),
        preferred_element_type=jnp.float32,
    )


def proj_sim(x_stacked, params):
    """x_stacked: [2, B, D_in]  ->  sim: [2, B, B] with sim[v] = feat_v @ feat_v.T."""
    w1, b1, w2, b2 = params
    _, B, D_in = x_stacked.shape
    H = w1.shape[1]
    d_out = w2.shape[1]
    return pl.pallas_call(
        proj_sim_kernel,
        out_shape=jax.ShapeDtypeStruct((2, B, B), jnp.float32),
        grid=(2,),
        in_specs=[
            pl.BlockSpec((None, B, D_in), lambda v: (v, 0, 0)),
            pl.BlockSpec((D_in, H), lambda v: (0, 0)),
            pl.BlockSpec((1, H), lambda v: (0, 0)),
            pl.BlockSpec((H, d_out), lambda v: (0, 0)),
            pl.BlockSpec((1, d_out), lambda v: (0, 0)),
        ],
        out_specs=pl.BlockSpec((None, B, B), lambda v: (v, 0, 0)),
        compiler_params=pltpu.CompilerParams(
            dimension_semantics=("parallel",),     # 2 TensorCores on v7x
            vmem_limit_bytes=_VMEM_LIMIT,
        ),
    )(x_stacked, w1, b1, w2, b2)


# --------------------------------------------------------------------------------------
# Kernel 2: supervised-contrastive loss for BOTH views from the precomputed gram
#           matrices.  (loss1 + loss2) / 2 == mean over all 2*B rows.
#   sim_ref  : [2, B, B]  (sim[0] = feat1@feat1.T, sim[1] = feat2@feat2.T)
#   mask_ref : [2, B, B]  (mask[0] = mask2*(1-eye), mask[1] = mask1*(1-eye))
# --------------------------------------------------------------------------------------
def sup_contra_pair_kernel(sim_ref, mask_ref, out_ref, *, inv_t):
    v, b, n = sim_ref.shape
    logits = sim_ref[...] * inv_t                                   # [2, B, B]
    row = lax.broadcasted_iota(jnp.int32, (v, b, n), 1)
    col = lax.broadcasted_iota(jnp.int32, (v, b, n), 2)
    not_diag = (row != col).astype(jnp.float32)
    # max-subtracted log-sum-exp (mathematically identical to the reference)
    lmax = jnp.max(logits, axis=2, keepdims=True)
    exp_l = jnp.exp(logits - lmax) * not_diag
    log_denom = jnp.log(jnp.sum(exp_l, axis=2, keepdims=True)) + lmax
    log_prob = logits - log_denom
    m = mask_ref[...]                                               # diag folded out
    m_sum = jnp.sum(m, axis=2, keepdims=True)
    mean_log_prob_pos = jnp.sum(m * log_prob, axis=2, keepdims=True) * pl.reciprocal(
        jnp.maximum(m_sum, 1e-12), approx=True)
    out_ref[0, 0] = -jnp.sum(mean_log_prob_pos) * (1.0 / (v * b))


def sup_contra_pair(sim, masks, inv_t):
    out = pl.pallas_call(
        functools.partial(sup_contra_pair_kernel, inv_t=inv_t),
        out_shape=jax.ShapeDtypeStruct((1, 1), jnp.float32),
        in_specs=[pl.BlockSpec(memory_space=pltpu.MemorySpace.VMEM)] * 2,
        out_specs=pl.BlockSpec(memory_space=pltpu.MemorySpace.SMEM),
        compiler_params=pltpu.CompilerParams(vmem_limit_bytes=_VMEM_LIMIT),
    )(sim, masks)
    return out[0, 0]


# --------------------------------------------------------------------------------------
# Glue: connected-component mask (torch.no_grad path; tiny b x b, plain JAX).
# TODO(synk): scipy.sparse.csgraph.connected_components has no Pallas equivalent;
#             replaced by boolean transitive closure over the symmetrized 1-NN
#             graph, which yields the identical same-component mask.
# --------------------------------------------------------------------------------------
def build_connected_component_mask(sim):
    b = sim.shape[0]
    d = sim - 2.0 * jnp.eye(b, dtype=sim.dtype)
    y = jnp.argmax(d, axis=1)                        # topk(k=1) neighbor, diag excluded
    adj = jax.nn.one_hot(y, b, dtype=jnp.float32)    # vectorized; no scatter
    reach = ((adj + adj.T + jnp.eye(b, dtype=jnp.float32)) > 0).astype(jnp.bfloat16)
    for _ in range(int(np.ceil(np.log2(max(b, 2)))) + 1):
        reach = (jnp.dot(reach, reach, preferred_element_type=jnp.float32) > 0
                 ).astype(jnp.bfloat16)
    return reach.astype(jnp.float32)  # mask[i, j] = 1 iff i, j in same component


# --------------------------------------------------------------------------------------
# WCL module (world_size == 1, rank == 0, as in the reference)
# --------------------------------------------------------------------------------------
def init_head(key, d_in, d_hidden, d_out):
    k1, k2 = jax.random.split(key)
    w1 = jax.random.normal(k1, (d_in, d_hidden), jnp.float32) * (1.0 / np.sqrt(d_in))
    b1 = jnp.zeros((1, d_hidden), jnp.float32)
    w2 = jax.random.normal(k2, (d_hidden, d_out), jnp.float32) * (1.0 / np.sqrt(d_hidden))
    b2 = jnp.zeros((1, d_out), jnp.float32)
    return (w1, b1, w2, b2)


@functools.partial(jax.jit, static_argnames=("t",))
def wcl_forward(head2_params, x1, x2, t=0.1):
    b = x1.shape[0]
    inv_t = 1.0 / t

    # Fused projection head + normalize + gram matrix, both views in one call.
    x = jnp.stack([x1, x2], axis=0)                       # [2, B, D_in]
    sim = proj_sim(x, head2_params)                       # [2, B, B]

    # Connected-component masks (tiny b x b, plain JAX).
    mask1 = build_connected_component_mask(sim[0])
    mask2 = build_connected_component_mask(sim[1])

    # Fold the diagonal mask in here; loss for view 0 uses mask2, view 1 uses mask1.
    not_diag = 1.0 - jnp.eye(b, dtype=jnp.float32)
    masks = jnp.stack([mask2, mask1], axis=0) * not_diag  # [2, B, B]

    # graph_loss = (sup_contra(sim1/t, mask2) + sup_contra(sim2/t, mask1)) / 2
    return sup_contra_pair(sim, masks, inv_t)


class WCLPallas:
    def __init__(self, key, dim_in=128, dim_hidden=128, dim_out=128):
        k1, k2 = jax.random.split(key)
        # head1 only feeds `logits`/`labels`, which the reference forward() never
        # returns -> that whole branch is dead w.r.t. graph_loss and is eliminated.
        self.head1 = init_head(k1, dim_in, dim_hidden, dim_out)
        self.head2 = init_head(k2, dim_in, dim_hidden, dim_out)

    def forward(self, x1, x2, t=0.1):
        return wcl_forward(self.head2, x1, x2, t=t)


if __name__ == "__main__":
    key = jax.random.PRNGKey(0)
    k_params, k_x1, k_x2 = jax.random.split(key, 3)

    B, D = 8, 128  # small stand-in for the module's (batch, 2048)
    x1 = jax.random.normal(k_x1, (B, D), jnp.float32)
    x2 = jax.random.normal(k_x2, (B, D), jnp.float32)

    model = WCLPallas(k_params, dim_in=D, dim_hidden=D, dim_out=D)
    loss = model.forward(x1, x2, t=0.1)
    loss = jax.block_until_ready(loss)
    assert np.isfinite(np.asarray(loss)), "non-finite loss"
    print("KERNEL_OK")
</pallas_src>

<mosaic_0001>
module attributes {stable_mosaic.version = 11 : i64} {
  func.func @proj_sim_kernel(%arg0: i32, %arg1: memref<1x8x128xf32, #tpu.memory_space<vmem>>, %arg2: memref<128x128xf32, #tpu.memory_space<vmem>>, %arg3: memref<1x128xf32, #tpu.memory_space<vmem>>, %arg4: memref<128x128xf32, #tpu.memory_space<vmem>>, %arg5: memref<1x128xf32, #tpu.memory_space<vmem>>, %arg6: memref<1x8x8xf32, #tpu.memory_space<vmem>>) attributes {dimension_semantics = [#tpu.dimension_semantics<parallel>], iteration_bounds = array<i64: 2>, scalar_prefetch = 0 : i64, scratch_operands = 0 : i64, tpu.core_type = #tpu.core_type<tc>, window_params = [{transform_indices = @transform_0, window_bounds = array<i64: 1, 8, 128>}, {pipeline_mode = #tpu.pipeline_mode<synchronous>, transform_indices = @transform_1, window_bounds = array<i64: 128, 128>}, {pipeline_mode = #tpu.pipeline_mode<synchronous>, transform_indices = @transform_2, window_bounds = array<i64: 1, 128>}, {pipeline_mode = #tpu.pipeline_mode<synchronous>, transform_indices = @transform_3, window_bounds = array<i64: 128, 128>}, {pipeline_mode = #tpu.pipeline_mode<synchronous>, transform_indices = @transform_4, window_bounds = array<i64: 1, 128>}, {transform_indices = @transform_5, window_bounds = array<i64: 1, 8, 8>}]} {
    %c0 = arith.constant 0 : index
    %c0_0 = arith.constant 0 : index
    %c0_1 = arith.constant 0 : index
    %0 = vector.load %arg1[%c0, %c0_0, %c0_1] : memref<1x8x128xf32, #tpu.memory_space<vmem>>, vector<1x8x128xf32>
    %1 = vector.shape_cast %0 : vector<1x8x128xf32> to vector<8x128xf32>
    %2 = arith.truncf %1 : vector<8x128xf32> to vector<8x128xbf16>
    %c0_2 = arith.constant 0 : index
    %c0_3 = arith.constant 0 : index
    %3 = vector.load %arg2[%c0_2, %c0_3] : memref<128x128xf32, #tpu.memory_space<vmem>>, vector<128x128xf32>
    %4 = arith.truncf %3 : vector<128x128xf32> to vector<128x128xbf16>
    %cst = arith.constant dense<0.000000e+00> : vector<8x128xf32>
    %5 = tpu.matmul %2, %4, %cst {dimension_numbers = #tpu.dot_dimension_numbers<[1], [0], [0], [1], [0, 0, 1, 1], [], []>} : vector<8x128xbf16>, vector<128x128xbf16>, vector<8x128xf32> -> vector<8x128xf32>
    %c0_4 = arith.constant 0 : index
    %c0_5 = arith.constant 0 : index
    %6 = vector.load %arg3[%c0_4, %c0_5] : memref<1x128xf32, #tpu.memory_space<vmem>>, vector<1x128xf32>
    %7 = vector.broadcast %6 : vector<1x128xf32> to vector<8x128xf32>
    %8 = arith.addf %5, %7 : vector<8x128xf32>
    %cst_6 = arith.constant 0.000000e+00 : f32
    %9 = vector.broadcast %cst_6 : f32 to vector<8x128xf32>
    %10 = arith.maximumf %8, %9 : vector<8x128xf32>
    %11 = arith.truncf %10 : vector<8x128xf32> to vector<8x128xbf16>
    %c0_7 = arith.constant 0 : index
    %c0_8 = arith.constant 0 : index
    %12 = vector.load %arg4[%c0_7, %c0_8] : memref<128x128xf32, #tpu.memory_space<vmem>>, vector<128x128xf32>
    %13 = arith.truncf %12 : vector<128x128xf32> to vector<128x128xbf16>
    %cst_9 = arith.constant dense<0.000000e+00> : vector<8x128xf32>
    %14 = tpu.matmul %11, %13, %cst_9 {dimension_numbers = #tpu.dot_dimension_numbers<[1], [0], [0], [1], [0, 0, 1, 1], [], []>} : vector<8x128xbf16>, vector<128x128xbf16>, vector<8x128xf32> -> vector<8x128xf32>
    %c0_10 = arith.constant 0 : index
    %c0_11 = arith.constant 0 : index
    %15 = vector.load %arg5[%c0_10, %c0_11] : memref<1x128xf32, #tpu.memory_space<vmem>>, vector<1x128xf32>
    %16 = vector.broadcast %15 : vector<1x128xf32> to vector<8x128xf32>
    %17 = arith.addf %14, %16 : vector<8x128xf32>
    %18 = arith.mulf %17, %17 : vector<8x128xf32>
    %cst_12 = arith.constant dense<0.000000e+00> : vector<8xf32>
    %19 = vector.multi_reduction <add>, %18, %cst_12 [1] : vector<8x128xf32> to vector<8xf32>
    %20 = vector.shape_cast %19 : vector<8xf32> to vector<8x1xf32>
    %cst_13 = arith.constant 1.000000e-24 : f32
    %21 = vector.broadcast %cst_13 : f32 to vector<8x1xf32>
    %22 = arith.maximumf %20, %21 : vector<8x1xf32>
    %23 = math.rsqrt %22 : vector<8x1xf32>
    %24 = vector.broadcast %23 : vector<8x1xf32> to vector<8x128xf32>
    %25 = arith.mulf %17, %24 : vector<8x128xf32>
    %26 = arith.truncf %25 : vector<8x128xf32> to vector<8x128xbf16>
    %cst_14 = arith.constant dense<0.000000e+00> : vector<8x8xf32>
    %27 = tpu.matmul %26, %26, %cst_14 {dimension_numbers = #tpu.dot_dimension_numbers<[1], [1], [0], [0], [0, 0, 1, 0], [], []>} : vector<8x128xbf16>, vector<8x128xbf16>, vector<8x8xf32> -> vector<8x8xf32>
    %c0_15 = arith.constant 0 : index
    %c0_16 = arith.constant 0 : index
    %c0_17 = arith.constant 0 : index
    %28 = vector.load %arg6[%c0_15, %c0_16, %c0_17] : memref<1x8x8xf32, #tpu.memory_space<vmem>>, vector<1x8x8xf32>
    %29 = vector.shape_cast %28 : vector<1x8x8xf32> to vector<8x8xf32>
    %30 = vector.shape_cast %27 : vector<8x8xf32> to vector<1x8x8xf32>
    tpu.vector_store %arg6[%c0_15, %c0_16, %c0_17], %30 {strides = array<i32>} : memref<1x8x8xf32, #tpu.memory_space<vmem>>, vector<1x8x8xf32>,
    return
  }
  func.func @transform_0(%arg0: i32) -> (i32, i32, i32) {
    %c0_i32 = arith.constant 0 : i32
    %c0_i32_0 = arith.constant 0 : i32
    %c0_i32_1 = arith.constant 0 : i32
    return %arg0, %c0_i32, %c0_i32_0 : i32, i32, i32
  }
  func.func @transform_1(%arg0: i32) -> (i32, i32) {
    %c0_i32 = arith.constant 0 : i32
    %c0_i32_0 = arith.constant 0 : i32
    %c0_i32_1 = arith.constant 0 : i32
    return %c0_i32, %c0_i32_0 : i32, i32
  }
  func.func @transform_2(%arg0: i32) -> (i32, i32) {
    %c0_i32 = arith.constant 0 : i32
    %c0_i32_0 = arith.constant 0 : i32
    %c0_i32_1 = arith.constant 0 : i32
    return %c0_i32, %c0_i32_0 : i32, i32
  }
  func.func @transform_3(%arg0: i32) -> (i32, i32) {
    %c0_i32 = arith.constant 0 : i32
    %c0_i32_0 = arith.constant 0 : i32
    %c0_i32_1 = arith.constant 0 : i32
    return %c0_i32, %c0_i32_0 : i32, i32
  }
  func.func @transform_4(%arg0: i32) -> (i32, i32) {
    %c0_i32 = arith.constant 0 : i32
    %c0_i32_0 = arith.constant 0 : i32
    %c0_i32_1 = arith.constant 0 : i32
    return %c0_i32, %c0_i32_0 : i32, i32
  }
  func.func @transform_5(%arg0: i32) -> (i32, i32, i32) {
    %c0_i32 = arith.constant 0 : i32
    %c0_i32_0 = arith.constant 0 : i32
    %c0_i32_1 = arith.constant 0 : i32
    return %arg0, %c0_i32, %c0_i32_0 : i32, i32, i32
  }
}

module attributes {stable_mosaic.version = 11 : i64} {
  func.func @sup_contra_pair_kernel(%arg0: memref<2x8x8xf32, #tpu.memory_space<vmem>>, %arg1: memref<2x8x8xf32, #tpu.memory_space<vmem>>, %arg2: memref<1x1xf32, #tpu.memory_space<smem>>) attributes {dimension_semantics = [], scalar_prefetch = 0 : i64, scratch_operands = 0 : i64, tpu.core_type = #tpu.core_type<tc>} {
    %c0 = arith.constant 0 : index
    %c0_0 = arith.constant 0 : index
    %c0_1 = arith.constant 0 : index
    %0 = vector.load %arg0[%c0, %c0_0, %c0_1] : memref<2x8x8xf32, #tpu.memory_space<vmem>>, vector<2x8x8xf32>
    %cst = arith.constant 1.000000e+01 : f32
    %1 = vector.broadcast %cst : f32 to vector<2x8x8xf32>
    %2 = arith.mulf %0, %1 : vector<2x8x8xf32>
    %3 = tpu.iota {dimensions = array<i32: 1>} : vector<2x8x8xi32>
    %4 = tpu.iota {dimensions = array<i32: 2>} : vector<2x8x8xi32>
    %5 = arith.cmpi ne, %3, %4 : vector<2x8x8xi32>
    %6 = arith.extui %5 : vector<2x8x8xi1> to vector<2x8x8xi32>
    %7 = arith.sitofp %6 : vector<2x8x8xi32> to vector<2x8x8xf32>
    %cst_2 = arith.constant dense<0xFF800000> : vector<2x8xf32>
    %8 = vector.multi_reduction <maximumf>, %2, %cst_2 [2] : vector<2x8x8xf32> to vector<2x8xf32>
    %9 = vector.shape_cast %8 : vector<2x8xf32> to vector<2x8x1xf32>
    %10 = vector.broadcast %9 : vector<2x8x1xf32> to vector<2x8x8xf32>
    %11 = arith.subf %2, %10 : vector<2x8x8xf32>
    %12 = math.exp %11 : vector<2x8x8xf32>
    %13 = arith.mulf %12, %7 : vector<2x8x8xf32>
    %cst_3 = arith.constant dense<0.000000e+00> : vector<2x8xf32>
    %14 = vector.multi_reduction <add>, %13, %cst_3 [2] : vector<2x8x8xf32> to vector<2x8xf32>
    %15 = vector.shape_cast %14 : vector<2x8xf32> to vector<2x8x1xf32>
    %16 = math.log %15 : vector<2x8x1xf32>
    %17 = arith.addf %16, %9 : vector<2x8x1xf32>
    %18 = vector.broadcast %17 : vector<2x8x1xf32> to vector<2x8x8xf32>
    %19 = arith.subf %2, %18 : vector<2x8x8xf32>
    %c0_4 = arith.constant 0 : index
    %c0_5 = arith.constant 0 : index
    %c0_6 = arith.constant 0 : index
    %20 = vector.load %arg1[%c0_4, %c0_5, %c0_6] : memref<2x8x8xf32, #tpu.memory_space<vmem>>, vector<2x8x8xf32>
    %cst_7 = arith.constant dense<0.000000e+00> : vector<2x8xf32>
    %21 = vector.multi_reduction <add>, %20, %cst_7 [2] : vector<2x8x8xf32> to vector<2x8xf32>
    %22 = vector.shape_cast %21 : vector<2x8xf32> to vector<2x8x1xf32>
    %23 = arith.mulf %20, %19 : vector<2x8x8xf32>
    %cst_8 = arith.constant dense<0.000000e+00> : vector<2x8xf32>
    %24 = vector.multi_reduction <add>, %23, %cst_8 [2] : vector<2x8x8xf32> to vector<2x8xf32>
    %25 = vector.shape_cast %24 : vector<2x8xf32> to vector<2x8x1xf32>
    %cst_9 = arith.constant 9.99999996E-13 : f32
    %26 = vector.broadcast %cst_9 : f32 to vector<2x8x1xf32>
    %27 = arith.maximumf %22, %26 : vector<2x8x1xf32>
    %28 = tpu.reciprocal %27 {approx = true} : vector<2x8x1xf32> -> vector<2x8x1xf32>
    %29 = arith.mulf %25, %28 : vector<2x8x1xf32>
    %30 = vector.shape_cast %29 : vector<2x8x1xf32> to vector<1x2x8x1xf32>
    %cst_10 = arith.constant dense<0.000000e+00> : vector<1xf32>
    %31 = vector.multi_reduction <add>, %30, %cst_10 [1, 2, 3] : vector<1x2x8x1xf32> to vector<1xf32>
    %32 = vector.shape_cast %31 : vector<1xf32> to vector<1x1x1x1xf32>
    %33 = vector.extract %32[0, 0, 0, 0] : f32 from vector<1x1x1x1xf32>
    %cst_11 = arith.constant 0.000000e+00 : f32
    %34 = arith.subf %cst_11, %33 : f32
    %cst_12 = arith.constant 6.250000e-02 : f32
    %35 = arith.mulf %34, %cst_12 : f32
    %c0_13 = arith.constant 0 : index
    %c0_14 = arith.constant 0 : index
    %36 = memref.load %arg2[%c0_13, %c0_14] : memref<1x1xf32, #tpu.memory_space<smem>>
    memref.store %35, %arg2[%c0_13, %c0_14] : memref<1x1xf32, #tpu.memory_space<smem>>
    return
  }
}

</mosaic_0001>

<bundles_post_ra>
// kernel: wcl_forward.2
= control target key start
LH: loop header
LB: loop body
LE: loop exit
PB: predicated region body
PF: predicated region fallthrough
CT: control target
= control target key end

     0   :  { %10 = vsyncpa [#allocation3], 0  ;;  %s874_s0 = inlined_call_operand.vmem [shape: f32[2,8,128], index: 0, kind: input, shape index: {}]   ;;  %s875_s1 = inlined_call_operand.hbm [shape: f32[128,128], index: 1, kind: input, shape index: {}]   ;;  %s876_s2 = inlined_call_operand.vmem [shape: f32[1,128], index: 2, kind: input, shape index: {}]   ;;  %s877_s3 = inlined_call_operand.hbm [shape: f32[128,128], index: 3, kind: input, shape index: {}]   ;;  %s878_s4 = inlined_call_operand.vmem [shape: f32[1,128], index: 4, kind: input, shape index: {}]   ;;  %s879_s5 = inlined_call_operand.vmem [shape: f32[2,8,8], index: 5, kind: output, shape index: {}]  }
   0x1   :  { %11 = vsyncpa [#allocation5], 0  ;;  %s745_s18 = smov 0  }
   0x2 LB: > { %s751_s19 = sadd.s32 4294967295, %s707_s18   ;;  %p523_p0 = scmp.ge.s32.totalorder %s707_s18, 1  ;;  %s707_s18 = sphi %s745_s18, %s17_s18  }
   0x3   : > { %p158_p1 = scmp.lt.s32.totalorder %s707_s18, 3  ;;  %s709_s20 = smov [#allocation2]  }
   0x4   : > { %s170_s21 = sshll.u32 %s709_s20, 4  ;;  %p880_p3 = scmp.eq.s32.totalorder %s751_s19, 0  ;;  %s171_s21 = int_to_ptr.vmem [resolvable:$true] %s170_s21 }
   0x5   : > { %p755_p2 = pnand %p523_p0, %p158_p1  ;;  %s710_s23 = smov [#allocation4]  }
   0x6   : > { %s186_s24 = sshll.u32 %s710_s23, 4  ;;  %s637_s28 = scalar_lea.hbm %s875_s1, 2048  ;;  %s768_s24 = int_to_ptr.vmem [resolvable:$true] %s186_s24 }
   0x7   : > { %s882_s22 = scalar_select %p755_p2, 1, 0 }
   0x8   : > { %p610_p4 = pneg %p755_p2  ;;  %p638_p6 = scmp.ne.s32.totalorder %s875_s1, %s637_s28 }
   0x9   : > { %p644_p10 = scmp.lt.u32.totalorder %s637_s28, %s875_s1 }
   0xa   : > { %p764_p5 = pnand %p880_p3, %p610_p4 }
   0xc   : > { %p639_p7 = pneg %p764_p5 }
   0xe   : > { %p640_p8 = pnand %p639_p7, %p638_p6 }
  0x10   : > { %p641_p9 = pneg %p640_p8 }
  0x12   : > { %p646_p11 = pnand %p644_p10, %p641_p9 }
  0x14   : > { %649 = shalt.err (!%p646_p11)
}
  0x15   : > { %s650_s8 = scalar_lea.vmem %s171_s21, 2048  ;;  %p658_p1 = scmp.lt.s32.totalorder %s171_s21, %s171_s21 }
  0x16   : > { %p651_p12 = scmp.ne.s32.totalorder %s171_s21, %s650_s8  ;;  %p659_p4 = scmp.lt.s32.totalorder %s650_s8, %s650_s8 }
  0x18   : > { %p653_p13 = pnand %p651_p12, %p639_p7  ;;  %p660_p3 = por %p659_p4, %p658_p1 }
  0x1a   : > { %p654_p0 = pneg %p653_p13 }
  0x1c   : > { %p661_p2 = pnand %p660_p3, %p654_p0 }
  0x1e   : > { %664 = shalt.err (!%p661_p2)
}
  0x1f   : > { %s711_s9 = smov 128   ;;  %s712_s10 = smov 8  }
  0x20   : > { %613 = dma.hbm_to_vmem [thread:$0]  (!%p764_p5), %s875_s1, 2048, %s171_s21, [#allocation3], %s711_s9, %s711_s9, %s712_s10  }
  0x21   : > { %s665_s15 = scalar_lea.hbm %s877_s3, 2048 }
  0x22   : > { %p666_p6 = scmp.ne.s32.totalorder %s877_s3, %s665_s15  ;;  %p672_p8 = scmp.lt.u32.totalorder %s665_s15, %s877_s3 }
  0x24   : > { %p668_p2 = pnand %p666_p6, %p639_p7 }
  0x26   : > { %p669_p3 = pneg %p668_p2 }
  0x28   : > { %p674_p9 = pnand %p672_p8, %p669_p3 }
  0x2a   : > { %677 = shalt.err (!%p674_p9)
}
  0x2b   : > { %s678_s21 = scalar_lea.vmem %s768_s24, 2048  ;;  %p686_p13 = scmp.lt.s32.totalorder %s768_s24, %s768_s24 }
  0x2c   : > { %p679_p10 = scmp.ne.s32.totalorder %s768_s24, %s678_s21  ;;  %p687_p0 = scmp.lt.s32.totalorder %s678_s21, %s678_s21 }
  0x2e   : > { %p681_p11 = pnand %p679_p10, %p639_p7  ;;  %p688_p1 = por %p687_p0, %p686_p13 }
  0x30   : > { %p682_p12 = pneg %p681_p11 }
  0x32   : > { %p689_p4 = pnand %p688_p1, %p682_p12 }
  0x34   : > { %692 = shalt.err (!%p689_p4)
}
  0x35   : > { %616 = dma.hbm_to_vmem [thread:$0]  (!%p764_p5), %s877_s3, 2048, %s768_s24, [#allocation5], %s711_s9, %s711_s9, %s712_s10  }
  0x36   : > { %p884_p6 = scmp.ne.s32.totalorder %s882_s22, 0 }
  0x37   : > { %p885_p2 = scmp.eq.s32.totalorder (!%p884_p6), %s751_s19, 0 }
  0x38   : > { %212 = sbr.rel (%p884_p6) target bundleno = 916 (0x394), region = 40 }
  0x3f   : > { %698 = dma.done.wait (%p885_p2), [#allocation3], 2048   ;;  %p886_p7 = pmov %p885_p2 }
  0x40   : > { %p887_p3 = pmov %p885_p2 }
  0x41   : > { %700 = vsyncadd (%p886_p7), [#allocation3], 4294965248 }
  0x42   : > { %702 = dma.done.wait (%p887_p3), [#allocation5], 2048   ;;  %p888_p8 = pmov %p885_p2 }
  0x43   : > { %v713_v0 = vmov 0.0   ;;  %vm714_vm0 = vmmov 0   ;;  %v253_v1 = vld [vmem:[#allocation2] sm:$0xff]  ;;  %v254_v2 = vld [vmem:[#allocation2 + $0x8] sm:$0xff]  ;;  %v255_v3 = vld [vmem:[#allocation2 + $0x10] sm:$0xff]  ;;  %p242_p5 = scmp.lt.s32.totalorder %s751_s19, 1 }
  0x44   : > { %704 = vsyncadd (%p888_p8), [#allocation5], 4294965248  ;;  %556 = vmatprep.subr.bf16.mxu0 %v713_v0  ;;  %572 = vmatprep.mubr.msk.bf16.mxu0 %vm714_vm0, %v713_v0  ;;  %v269_v4 = vpack.c.bf16 %v254_v2, %v253_v1  ;;  %v256_v5 = vld [vmem:[#allocation2 + $0x18] sm:$0xff]  ;;  %v257_v7 = vld [vmem:[#allocation2 + $0x20] sm:$0xff]  ;;  %vm444_vm1 = vcmask 64512  }
  0x45   : > { %576 = vmatprep.subr.bf16.mxu1 %v713_v0  ;;  %592 = vmatprep.mubr.msk.bf16.mxu1 %vm714_vm0, %v713_v0  ;;  %v270_v6 = vpack.c.bf16 %v256_v5, %v255_v3  ;;  %v258_v8 = vld [vmem:[#allocation2 + $0x28] sm:$0xff]  ;;  %v326_v9 = vld [vmem:[#allocation4] sm:$0xff]  ;;  %v328_v11 = vld [vmem:[#allocation4 + $0x10] sm:$0xff]  ;;  %s890_s19 = smov (!%p242_p5, %s751_s19), 1 }
  0x46   : > { %557 = vmatpush3.bf16.msra.mxu0 %v269_v4  ;;  %v327_v10 = vld [vmem:[#allocation4 + $0x8] sm:$0xff]  ;;  %v329_v12 = vld [vmem:[#allocation4 + $0x18] sm:$0xff]  ;;  %v271_v13 = vpack.c.bf16 %v258_v8, %v257_v7  ;;  %v259_v15 = vld [vmem:[#allocation2 + $0x30] sm:$0xff]  ;;  %s530_s22 = sshll.u32 %s890_s19, 3 }
  0x47   : > { %558 = vmatprep.subr.bf16.mxu0 %v713_v0  ;;  %v342_v14 = vpack.c.bf16 %v327_v10, %v326_v9  ;;  %v260_v16 = vld [vmem:[#allocation2 + $0x38] sm:$0xff]  ;;  %v343_v17 = vpack.c.bf16 %v329_v12, %v328_v11  ;;  %v330_v18 = vld [vmem:[#allocation4 + $0x20] sm:$0xff]  ;;  %v331_v19 = vld [vmem:[#allocation4 + $0x28] sm:$0xff]  ;;  %s245_s28 = scalar_lea.vmem %s874_s0, %s530_s22  ;;  %s249_s10 = scalar_lea.vmem %s879_s5, %s530_s22 }
  0x48   : > { %v272_v20 = vpack.c.bf16 %v260_v16, %v259_v15  ;;  %v261_v21 = vld [vmem:[#allocation2 + $0x40] sm:$0xff]  ;;  %v262_v22 = vld [vmem:[#allocation2 + $0x48] sm:$0xff]  ;;  %v344_v23 = vpack.c.bf16 %v331_v19, %v330_v18  ;;  %v332_v24 = vld [vmem:[#allocation4 + $0x30] sm:$0xff] }
  0x49   : > { %577 = vmatpush3.bf16.msra.mxu1 %v342_v14  ;;  %v333_v25 = vld [vmem:[#allocation4 + $0x38] sm:$0xff]  ;;  %v273_v26 = vpack.c.bf16 %v262_v22, %v261_v21  ;;  %v263_v27 = vld [vmem:[#allocation2 + $0x50] sm:$0xff]  ;;  %v334_v30 = vld [vmem:[#allocation4 + $0x40] sm:$0xff] }
  0x4a   : > { %559 = vmatpush3.bf16.msra.mxu0 %v270_v6  ;;  %578 = vmatprep.subr.bf16.mxu1 %v713_v0  ;;  %v264_v28 = vld [vmem:[#allocation2 + $0x58] sm:$0xff]  ;;  %v345_v29 = vpack.c.bf16 %v333_v25, %v332_v24  ;;  %v335_v31 = vld [vmem:[#allocation4 + $0x48] sm:$0xff]  ;;  %v265_v33 = vld [vmem:[#allocation2 + $0x60] sm:$0xff] }
  0x4b   : > { %560 = vmatprep.subr.bf16.mxu0 %v713_v0  ;;  %v274_v32 = vpack.c.bf16 %v264_v28, %v263_v27  ;;  %v266_v34 = vld [vmem:[#allocation2 + $0x68] sm:$0xff]  ;;  %v346_v35 = vpack.c.bf16 %v335_v31, %v334_v30  ;;  %v336_v36 = vld [vmem:[#allocation4 + $0x50] sm:$0xff]  ;;  %v337_v37 = vld [vmem:[#allocation4 + $0x58] sm:$0xff] }
  0x4c   : > { %v275_v38 = vpack.c.bf16 %v266_v34, %v265_v33  ;;  %v267_v39 = vld [vmem:[#allocation2 + $0x70] sm:$0xff]  ;;  %v268_v40 = vld [vmem:[#allocation2 + $0x78] sm:$0xff]  ;;  %v347_v41 = vpack.c.bf16 %v337_v37, %v336_v36  ;;  %v251_v43 = vld [vmem:[%s245_s28] sm:$0xff] }
  0x4d   : > { %579 = vmatpush3.bf16.msra.mxu1 %v343_v17  ;;  %v276_v42 = vpack.c.bf16 %v268_v40, %v267_v39  ;;  %v252_v44 = vpack.c.bf16 %v251_v43, %v251_v43  ;;  %v338_v45 = vld [vmem:[#allocation4 + $0x60] sm:$0xff]  ;;  %v339_v46 = vld [vmem:[#allocation4 + $0x68] sm:$0xff]  ;;  %v340_v48 = vld [vmem:[#allocation4 + $0x70] sm:$0xff] }
  0x4e   : > { %561 = vmatpush3.bf16.msra.mxu0 %v271_v13  ;;  %580 = vmatprep.subr.bf16.mxu1 %v713_v0  ;;  %v348_v47 = vpack.c.bf16 %v339_v46, %v338_v45  ;;  %v341_v49 = vld [vmem:[#allocation4 + $0x78] sm:$0xff]  ;;  %v532_v51 = vld [vmem:[%s876_s2] ss:$0 sm:$0xff] }
  0x4f   : > { %562 = vmatprep.subr.bf16.mxu0 %v713_v0  ;;  %v349_v50 = vpack.c.bf16 %v341_v49, %v340_v48  ;;  %v533_v59 = vld [vmem:[%s878_s4] ss:$0 sm:$0xff] }
  0x51   : > { %581 = vmatpush3.bf16.msra.mxu1 %v344_v23 }
  0x52   : > { %563 = vmatpush3.bf16.msra.mxu0 %v272_v20  ;;  %582 = vmatprep.subr.bf16.mxu1 %v713_v0 }
  0x53   : > { %564 = vmatprep.subr.bf16.mxu0 %v713_v0 }
  0x55   : > { %583 = vmatpush3.bf16.msra.mxu1 %v345_v29 }
  0x56   : > { %565 = vmatpush3.bf16.msra.mxu0 %v273_v26  ;;  %584 = vmatprep.subr.bf16.mxu1 %v713_v0 }
  0x57   : > { %566 = vmatprep.subr.bf16.mxu0 %v713_v0 }
  0x59   : > { %585 = vmatpush3.bf16.msra.mxu1 %v346_v35 }
  0x5a   : > { %567 = vmatpush3.bf16.msra.mxu0 %v274_v32  ;;  %586 = vmatprep.subr.bf16.mxu1 %v713_v0 }
  0x5b   : > { %568 = vmatprep.subr.bf16.mxu0 %v713_v0 }
  0x5d   : > { %587 = vmatpush3.bf16.msra.mxu1 %v347_v41 }
  0x5e   : > { %569 = vmatpush3.bf16.msra.mxu0 %v275_v38  ;;  %588 = vmatprep.subr.bf16.mxu1 %v713_v0 }
  0x5f   : > { %570 = vmatprep.subr.bf16.mxu0 %v713_v0 }
  0x61   : > { %589 = vmatpush3.bf16.msra.mxu1 %v348_v47 }
  0x62   : > { %571 = vmatpush3.bf16.msra.mxu0 %v276_v42  ;;  %590 = vmatprep.subr.bf16.mxu1 %v713_v0 }
  0x63   : > { %596 = vmatprep.subr.bf16.mxu0 %v713_v0 }
  0x65   : > { %573 = vmatmul.mubr.bf16.vlgmr.msra.gmra.mrb[0].mxu0 %v252_v44  ;;  %591 = vmatpush3.bf16.msra.mxu1 %v349_v50 }
  0x66   : > { %598 = vmatprep.mubr.msk.bf16.mxu0 %vm714_vm0, %v713_v0 }
 0x138   : > { %v318_v52 = vpop.f32.mrb[0].mxu0 }
 0x139   : > { %v319_v53 = vadd.f32 %v532_v51, %v318_v52  ;;  %v574_v54 = vpop.f32.mrb[1].mxu0 }
 0x13a   : > { %v321_v55 = vpop.f32.mrb[2].mxu0 }
 0x13b   : > { %v324_v56 = vmax.f32 %v319_v53, 0.0  ;;  %v575_v57 = vpop.f32.mrb[3].mxu0 }
 0x13d   : > { %v325_v58 = vpack.c.bf16 %v324_v56, %v324_v56 }
 0x13f   : > { %593 = vmatmul.mubr.bf16.vlgmr.msra.gmra.mrb[0].mxu1 %v325_v58 }
 0x212   : > { %v391_v60 = vpop.f32.mrb[0].mxu1 }
 0x213   : > { %v392_v61 = vadd.f32 %v533_v59, %v391_v60  ;;  %v594_v62 = vpop.f32.mrb[1].mxu1 }
 0x214   : > { %v394_v63 = vpop.f32.mrb[2].mxu1 }
 0x215   : > { %v595_v0 = vpop.f32.mrb[3].mxu1  ;;  %v397_v1 = vmul.f32 %v392_v61, %v392_v61 }
 0x217   : > { %398 = vadd.xlane.f32.xlu0 %v397_v1 }
 0x2a4   : > { %v399_v2 = vpop.xlane.xlu0 %398 }
 0x2a5   : > { %v400_v3 = vmax.f32 %v399_v2, 1e-24 }
 0x2a7   : > { %635 = vrsqrt.f32 %v400_v3 }
 0x2b1   : > { %v636_v4 = vpop.eup %635 }
 0x2b2   : > { %v402_v5 = vmul.f32 %v636_v4, %v392_v61 }
 0x2b4   : > { %v403_v6 = vpack.c.bf16 %v402_v5, %v402_v5 }
 0x2b6   : > { %597 = vmatpush3.bf16.xpose.msra.mxu0 %v403_v6 }
 0x2bd   : > { %599 = vmatmul.mubr.bf16.vlgmr.msra.gmra.mrb[4].mxu0 %v403_v6 }
 0x390   : > { %v438_v7 = vpop.f32.mrb[4].mxu0 }
 0x391   : > { %445 = vst.msk [vmem:[%s249_s10] sm:$0xff] %vm444_vm1, %v438_v7  ;;  %v600_v8 = vpop.f32.mrb[5].mxu0 }
 0x392   : > { %v441_v9 = vpop.f32.mrb[6].mxu0 }
 0x393   : > { %v601_v10 = vpop.f32.mrb[7].mxu0 }
 0x394 PF: > { %s17_s18 = sadd.s32 1, %s707_s18  }
 0x395   : > { %p14_p9 = scmp.ge.s32.totalorder %s17_s18, 4  }
 0x397   :  { %16 = sbr.rel (!%p14_p9) target bundleno = 2 (0x2), region = 79 }
 0x39e   :  { %465 = vsyncpa [#allocation3], 1 }
 0x39f   :  { %467 = vsyncpa [#allocation3 + $0x1], 1 }
 0x3a0   :  { %468 = vsyncpa [#allocation5], 1 }

// kernel: wcl_forward.3
= control target key start
LH: loop header
LB: loop body
LE: loop exit
PB: predicated region body
PF: predicated region fallthrough
CT: control target
= control target key end

     0   :  { %vm23_vm0 = vcmask 64512   ;;  %s182_s0 = inlined_call_operand.vmem [shape: f32[2,8,8], index: 0, kind: input, shape index: {}]   ;;  %s183_s1 = inlined_call_operand.vmem [shape: f32[2,8,8], index: 1, kind: input, shape index: {}]   ;;  %s184_s2 = inlined_call_operand.hbm [shape: f32[1,1], index: 2, kind: output, shape index: {}]  }
   0x1   :  { %v12_v0 = vld [vmem:[%s182_s0] sm:$0xff]  ;;  %v13_v1 = vld [vmem:[%s182_s0 + $0x8] sm:$0xff] }
   0x2   :  { %7 = vsyncpa [#allocation3], 0  ;;  %v14_v2 = vmul.f32 10.0, %v12_v0  ;;  %v15_v3 = vmul.f32 10.0, %v13_v1  ;;  %v16_v8 = vlaneseq  ;;  %v133_v15 = vmov 0.0   ;;  %v52_v23 = vld [vmem:[%s183_s1] sm:$0xff] }
   0x3   :  { %v54_v24 = vsel %vm23_vm0, %v52_v23, 0.0  ;;  %v53_v25 = vld [vmem:[%s183_s1 + $0x8] sm:$0xff]  ;;  %vm74_vm2 = vcmask 7168   ;;  %s121_s20 = scalar_lea.hbm %s184_s2, 16 }
   0x4   :  { %v24_v4 = vsel %vm23_vm0, %v14_v2, -inf  ;;  %v27_v5 = vsel %vm23_vm0, %v15_v3, -inf  ;;  %v17_v12 = vshrl.u32 %v16_v8, 7  ;;  %v19_v13 = vand.u32 127, %v16_v8  ;;  %p122_p0 = scmp.ne.s32.totalorder %s184_s2, %s121_s20  ;;  %p125_p1 = scmp.lt.u32.totalorder %s121_s20, %s184_s2 }
   0x5   :  { %25 = vmax.xlane.f32.xlu0 %v24_v4  ;;  %v57_v26 = vsel %vm23_vm0, %v53_v25, 0.0 }
   0x6   :  { %vm20_vm1 = vcmp.ne.s32.totalorder %v17_v12, %v19_v13  ;;  %p127_p2 = pnand %p125_p1, %p122_p0 }
   0x7   :  { %v104_v16 = vsel %vm20_vm1, 1.0, %v133_v15 }
   0x9   :  { %28 = vmax.xlane.f32.xlu0 %v27_v5 }
   0xd   :  { %55 = vadd.xlane.f32.xlu0 %v54_v24 }
  0x92   :  { %v26_v6 = vpop.xlane.xlu0 %25 }
  0x93   :  { %v30_v7 = vsub.f32 %v14_v2, %v26_v6 }
  0x95   :  { %v32_v9 = vmul.f32 1.442695, %v30_v7 }
  0x96   :  { %v29_v10 = vpop.xlane.xlu0 %28 }
  0x97   :  { %109 = vpow2.f32 %v32_v9  ;;  %v31_v11 = vsub.f32 %v15_v3, %v29_v10 }
  0x99   :  { %v34_v14 = vmul.f32 1.442695, %v31_v11 }
  0x9a   :  { %v56_v41 = vpop.xlane.xlu0 %55 }
  0x9b   :  { %111 = vpow2.f32 %v34_v14  ;;  %v68_v43 = vmax.f32 %v56_v41, 1e-12 }
  0xa1   :  { %v110_v17 = vpop.eup %109 }
  0xa2   :  { %v36_v18 = vmul.f32 %v110_v17, %v104_v16 }
  0xa4   :  { %v38_v19 = vsel %vm23_vm0, %v36_v18, 0.0 }
  0xa5   :  { %v112_v20 = vpop.eup %111  ;;  %39 = vadd.xlane.f32.xlu1 %v38_v19 }
  0xa6   :  { %v37_v21 = vmul.f32 %v112_v20, %v104_v16 }
  0xa8   :  { %v41_v22 = vsel %vm23_vm0, %v37_v21, 0.0 }
  0xa9   :  { %42 = vadd.xlane.f32.xlu1 %v41_v22 }
  0xad   :  { %58 = vadd.xlane.f32.xlu1 %v57_v26 }
 0x132   :  { %v40_v27 = vpop.xlane.xlu1 %39 }
 0x133   :  { %113 = vlog2.f32 %v40_v27 }
 0x136   :  { %v43_v28 = vpop.xlane.xlu1 %42 }
 0x137   :  { %115 = vlog2.f32 %v43_v28 }
 0x138   :  { %117 = vrcp.f32 %v68_v43 }
 0x13a   :  { %v59_v42 = vpop.xlane.xlu1 %58 }
 0x13b   :  { %v69_v44 = vmax.f32 %v59_v42, 1e-12 }
 0x13d   :  { %v114_v29 = vpop.eup %113  ;;  %119 = vrcp.f32 %v69_v44 }
 0x13e   :  { %v45_v30 = vmul.f32 0.6931472, %v114_v29 }
 0x140   :  { %v48_v31 = vadd.f32 %v45_v30, %v26_v6 }
 0x141   :  { %v116_v32 = vpop.eup %115 }
 0x142   :  { %v47_v33 = vmul.f32 0.6931472, %v116_v32  ;;  %v50_v34 = vsub.f32 %v14_v2, %v48_v31  ;;  %v118_v45 = vpop.eup %117 }
 0x144   :  { %v49_v35 = vadd.f32 %v47_v33, %v29_v10  ;;  %v60_v36 = vmul.f32 %v52_v23, %v50_v34 }
 0x146   :  { %v62_v37 = vsel %vm23_vm0, %v60_v36, 0.0  ;;  %v51_v38 = vsub.f32 %v15_v3, %v49_v35 }
 0x147   :  { %63 = vadd.xlane.f32.xlu0 %v62_v37  ;;  %v120_v47 = vpop.eup %119 }
 0x148   :  { %v61_v39 = vmul.f32 %v53_v25, %v51_v38 }
 0x14a   :  { %v65_v40 = vsel %vm23_vm0, %v61_v39, 0.0 }
 0x14b   :  { %66 = vadd.xlane.f32.xlu1 %v65_v40 }
 0x1d4   :  { %v64_v46 = vpop.xlane.xlu0 %63 }
 0x1d5   :  { %v72_v48 = vmul.f32 %v118_v45, %v64_v46 }
 0x1d7   :  { %v75_v51 = vsel %vm74_vm2, %v72_v48, 0.0 }
 0x1d8   :  { %v67_v49 = vpop.xlane.xlu1 %66 }
 0x1d9   :  { %v73_v50 = vmul.f32 %v120_v47, %v67_v49 }
 0x1db   :  { %v76_v52 = vsel %vm74_vm2, %v73_v50, 0.0 }
 0x1dc   :  { %v77_v53 = vadd.f32 %v76_v52, %v75_v51 }
 0x1de   :  { %78 = vadd.xlane.f32.xlu0 %v77_v53 }
 0x26b   :  { %v79_v54 = vpop.xlane.xlu0 %78 }
 0x26c   :  { %v80_v55 = vrot.slane %v79_v54, 4 }
 0x26e   :  { %v81_v56 = vadd.f32 %v80_v55, %v79_v54 }
 0x270   :  { %v82_v57 = vrot.slane %v81_v56, 2 }
 0x272   :  { %v83_v58 = vadd.f32 %v82_v57, %v81_v56 }
 0x274   :  { %v84_v59 = vrot.slane %v83_v58, 1 }
 0x276   :  { %v85_v60 = vadd.f32 %v84_v59, %v83_v58 }
 0x278   :  { %105 = vpush %v85_v60 }
 0x2a9   :  { %s106_s1 = spop %105 }
 0x2aa   :  { %s87_s16 = ssub.f32 0.0, %s106_s1 }
 0x2ac   :  { %s88_s17 = smul.f32 0.0625, %s87_s16 }
 0x2ae   :  { %90 = sst [smem:[#allocation2]] %s88_s17 }
 0x2af   :  { %130 = shalt.err (!%p127_p2)
}
 0x2b0   :  { %s134_s25 = smov [#allocation2]  }
 0x2b1   :  { %98 = dma.smem_to_hbm %s134_s25, 16, %s184_s2, [#allocation3]  }
 0x2b2   :  { %131 = dma.done.wait [#allocation3], 16  }
 0x2b3   :  { %132 = vsyncadd [#allocation3], 4294967280 }
 0x2b4   :  { %102 = sfence }
 0x2b5   :  { %103 = vsyncpa [#allocation3], 1 }

</bundles_post_ra>
